<compile_context>
chip_gen: v5e
topology: v5e:2x2
jax: 0.10.0
libtpu: 0.0.40
codegen_flags: <defaults>
</compile_context>

<pallas_src>
import math

import jax
import jax.numpy as jnp
from jax.experimental import pallas as pl
from jax.experimental.pallas import tpu as pltpu


def _mlp_kernel(x_ref, w1_ref, b1_ref, w2_ref, b2_ref, o_ref):
    # Single bf16 cast of the activation tile for the fc1 MXU matmul.
    x = x_ref[...].astype(jnp.bfloat16)                          # (tm, H)

    # fc1: (tm, H) @ (H, F) -> f32 accumulate, bias add in f32.
    h = jnp.dot(x, w1_ref[...],
                preferred_element_type=jnp.float32) + b1_ref[...]

    # TODO(synk): PyTorch nn.GELU() default is exact (erf); tanh-approx GELU is
    # used because erf is not guaranteed to lower in Mosaic.
    h = jax.nn.gelu(h, approximate=True)

    # fc2: (tm, F) @ (F, H) -> f32 accumulate, bias add in f32.
    y = jnp.dot(h.astype(jnp.bfloat16), w2_ref[...],
                preferred_element_type=jnp.float32) + b2_ref[...]

    # nn.Dropout: identity at inference.
    o_ref[...] = y.astype(o_ref.dtype)


def mlp_forward(x, w1, b1, w2, b2, *, tile_m=256):
    """x: (..., H) -> (..., H) through fc1 -> GELU -> fc2 (dropout = id)."""
    orig_shape = x.shape
    H = orig_shape[-1]
    F = w1.shape[1]

    x2 = x.reshape(-1, H)
    BS = x2.shape[0]

    # Row tile: multiple of 8 sublanes when tiling; the row-tile grid axis is
    # "parallel" so v7x's second TensorCore can take half the rows.
    if BS > tile_m:
        tm = tile_m
        pad = (-BS) % tm
        if pad:
            x2 = jnp.pad(x2, ((0, pad), (0, 0)))
    else:
        tm = BS                      # single tile == full array: always legal
        pad = 0
    rows = x2.shape[0]
    grid = (rows // tm,)

    out = pl.pallas_call(
        _mlp_kernel,
        grid=grid,
        in_specs=[
            pl.BlockSpec((tm, H), lambda i: (i, 0)),   # activations (row-tiled)
            pl.BlockSpec((H, F), lambda i: (0, 0)),    # fc1 weight (resident)
            pl.BlockSpec((1, F), lambda i: (0, 0)),    # fc1 bias
            pl.BlockSpec((F, H), lambda i: (0, 0)),    # fc2 weight (resident)
            pl.BlockSpec((1, H), lambda i: (0, 0)),    # fc2 bias
        ],
        out_specs=pl.BlockSpec((tm, H), lambda i: (i, 0)),
        out_shape=jax.ShapeDtypeStruct((rows, H), x.dtype),
        compiler_params=pltpu.CompilerParams(
            dimension_semantics=("parallel",)),
    )(
        x2,
        w1.astype(jnp.bfloat16),
        b1.reshape(1, F).astype(jnp.float32),
        w2.astype(jnp.bfloat16),
        b2.reshape(1, H).astype(jnp.float32),
    )

    if pad:
        out = out[:BS]
    return out.reshape(orig_shape)


def init_mlp_params(key, h_dim, mlp_ratio):
    """PyTorch nn.Linear default init: U(-1/sqrt(fan_in), 1/sqrt(fan_in))."""
    k1, k2, k3, k4 = jax.random.split(key, 4)

    def linear(kw, kb, fan_in, fan_out):
        bound = 1.0 / math.sqrt(fan_in)
        w = jax.random.uniform(kw, (fan_in, fan_out), jnp.float32, -bound, bound)
        b = jax.random.uniform(kb, (fan_out,), jnp.float32, -bound, bound)
        return w, b

    w1, b1 = linear(k1, k2, h_dim, mlp_ratio * h_dim)
    w2, b2 = linear(k3, k4, mlp_ratio * h_dim, h_dim)
    return w1, b1, w2, b2


if __name__ == "__main__":
    # Small shapes consistent with the module (Decision-Transformer defaults).
    h_dim, mlp_ratio = 32, 4
    B, T = 2, 8

    root = jax.random.PRNGKey(0)
    pkey, xkey = jax.random.split(root)
    w1, b1, w2, b2 = init_mlp_params(pkey, h_dim, mlp_ratio)
    x = jax.random.normal(xkey, (B, T, h_dim), jnp.float32)

    y = mlp_forward(x, w1, b1, w2, b2)
    y = jax.block_until_ready(y)

    # Plain-JAX reference (same tanh-approx GELU; bf16 matmul tolerance).
    ref = jax.nn.gelu(x @ w1 + b1, approximate=True) @ w2 + b2

    assert y.shape == (B, T, h_dim)
    assert bool(jnp.all(jnp.isfinite(y)))
    assert bool(jnp.allclose(y, ref, atol=5e-2, rtol=5e-2))
    print("KERNEL_OK")
</pallas_src>

<mosaic_0001>
module attributes {stable_mosaic.version = 11 : i64} {
  func.func @_mlp_kernel(%arg0: i32, %arg1: memref<16x32xf32, #tpu.memory_space<vmem>>, %arg2: memref<32x128xbf16, #tpu.memory_space<vmem>>, %arg3: memref<1x128xf32, #tpu.memory_space<vmem>>, %arg4: memref<128x32xbf16, #tpu.memory_space<vmem>>, %arg5: memref<1x32xf32, #tpu.memory_space<vmem>>, %arg6: memref<16x32xf32, #tpu.memory_space<vmem>>) attributes {dimension_semantics = [#tpu.dimension_semantics<parallel>], iteration_bounds = array<i64: 1>, scalar_prefetch = 0 : i64, scratch_operands = 0 : i64, tpu.core_type = #tpu.core_type<tc>, window_params = [{transform_indices = @transform_0, window_bounds = array<i64: 16, 32>}, {pipeline_mode = #tpu.pipeline_mode<synchronous>, transform_indices = @transform_1, window_bounds = array<i64: 32, 128>}, {pipeline_mode = #tpu.pipeline_mode<synchronous>, transform_indices = @transform_2, window_bounds = array<i64: 1, 128>}, {pipeline_mode = #tpu.pipeline_mode<synchronous>, transform_indices = @transform_3, window_bounds = array<i64: 128, 32>}, {pipeline_mode = #tpu.pipeline_mode<synchronous>, transform_indices = @transform_4, window_bounds = array<i64: 1, 32>}, {transform_indices = @transform_5, window_bounds = array<i64: 16, 32>}]} {
    %c0 = arith.constant 0 : index
    %c0_0 = arith.constant 0 : index
    %0 = vector.load %arg1[%c0, %c0_0] : memref<16x32xf32, #tpu.memory_space<vmem>>, vector<16x32xf32>
    %1 = arith.truncf %0 : vector<16x32xf32> to vector<16x32xbf16>
    %c0_1 = arith.constant 0 : index
    %c0_2 = arith.constant 0 : index
    %2 = vector.load %arg2[%c0_1, %c0_2] : memref<32x128xbf16, #tpu.memory_space<vmem>>, vector<32x128xbf16>
    %cst = arith.constant dense<0.000000e+00> : vector<16x128xf32>
    %3 = tpu.matmul %1, %2, %cst {dimension_numbers = #tpu.dot_dimension_numbers<[1], [0], [0], [1], [0, 0, 1, 1], [], []>} : vector<16x32xbf16>, vector<32x128xbf16>, vector<16x128xf32> -> vector<16x128xf32>
    %c0_3 = arith.constant 0 : index
    %c0_4 = arith.constant 0 : index
    %4 = vector.load %arg3[%c0_3, %c0_4] : memref<1x128xf32, #tpu.memory_space<vmem>>, vector<1x128xf32>
    %5 = vector.broadcast %4 : vector<1x128xf32> to vector<16x128xf32>
    %6 = arith.addf %3, %5 : vector<16x128xf32>
    %7 = arith.mulf %6, %6 : vector<16x128xf32>
    %8 = arith.mulf %6, %7 : vector<16x128xf32>
    %cst_5 = arith.constant 4.471500e-02 : f32
    %9 = vector.broadcast %cst_5 : f32 to vector<16x128xf32>
    %10 = arith.mulf %9, %8 : vector<16x128xf32>
    %11 = arith.addf %6, %10 : vector<16x128xf32>
    %cst_6 = arith.constant 0.797884583 : f32
    %12 = vector.broadcast %cst_6 : f32 to vector<16x128xf32>
    %13 = arith.mulf %12, %11 : vector<16x128xf32>
    %14 = math.tanh %13 : vector<16x128xf32>
    %cst_7 = arith.constant 1.000000e+00 : f32
    %15 = vector.broadcast %cst_7 : f32 to vector<16x128xf32>
    %16 = arith.addf %15, %14 : vector<16x128xf32>
    %cst_8 = arith.constant 5.000000e-01 : f32
    %17 = vector.broadcast %cst_8 : f32 to vector<16x128xf32>
    %18 = arith.mulf %17, %16 : vector<16x128xf32>
    %19 = arith.mulf %6, %18 : vector<16x128xf32>
    %20 = arith.truncf %19 : vector<16x128xf32> to vector<16x128xbf16>
    %c0_9 = arith.constant 0 : index
    %c0_10 = arith.constant 0 : index
    %21 = vector.load %arg4[%c0_9, %c0_10] : memref<128x32xbf16, #tpu.memory_space<vmem>>, vector<128x32xbf16>
    %cst_11 = arith.constant dense<0.000000e+00> : vector<16x32xf32>
    %22 = tpu.matmul %20, %21, %cst_11 {dimension_numbers = #tpu.dot_dimension_numbers<[1], [0], [0], [1], [0, 0, 1, 1], [], []>} : vector<16x128xbf16>, vector<128x32xbf16>, vector<16x32xf32> -> vector<16x32xf32>
    %c0_12 = arith.constant 0 : index
    %c0_13 = arith.constant 0 : index
    %23 = vector.load %arg5[%c0_12, %c0_13] : memref<1x32xf32, #tpu.memory_space<vmem>>, vector<1x32xf32>
    %24 = vector.broadcast %23 : vector<1x32xf32> to vector<16x32xf32>
    %25 = arith.addf %22, %24 : vector<16x32xf32>
    %c0_14 = arith.constant 0 : index
    %c0_15 = arith.constant 0 : index
    %26 = vector.load %arg6[%c0_14, %c0_15] : memref<16x32xf32, #tpu.memory_space<vmem>>, vector<16x32xf32>
    tpu.vector_store %arg6[%c0_14, %c0_15], %25 {strides = array<i32>} : memref<16x32xf32, #tpu.memory_space<vmem>>, vector<16x32xf32>,
    return
  }
  func.func @transform_0(%arg0: i32) -> (i32, i32) {
    %c0_i32 = arith.constant 0 : i32
    %c0_i32_0 = arith.constant 0 : i32
    return %arg0, %c0_i32 : i32, i32
  }
  func.func @transform_1(%arg0: i32) -> (i32, i32) {
    %c0_i32 = arith.constant 0 : i32
    %c0_i32_0 = arith.constant 0 : i32
    %c0_i32_1 = arith.constant 0 : i32
    return %c0_i32, %c0_i32_0 : i32, i32
  }
  func.func @transform_2(%arg0: i32) -> (i32, i32) {
    %c0_i32 = arith.constant 0 : i32
    %c0_i32_0 = arith.constant 0 : i32
    %c0_i32_1 = arith.constant 0 : i32
    return %c0_i32, %c0_i32_0 : i32, i32
  }
  func.func @transform_3(%arg0: i32) -> (i32, i32) {
    %c0_i32 = arith.constant 0 : i32
    %c0_i32_0 = arith.constant 0 : i32
    %c0_i32_1 = arith.constant 0 : i32
    return %c0_i32, %c0_i32_0 : i32, i32
  }
  func.func @transform_4(%arg0: i32) -> (i32, i32) {
    %c0_i32 = arith.constant 0 : i32
    %c0_i32_0 = arith.constant 0 : i32
    %c0_i32_1 = arith.constant 0 : i32
    return %c0_i32, %c0_i32_0 : i32, i32
  }
  func.func @transform_5(%arg0: i32) -> (i32, i32) {
    %c0_i32 = arith.constant 0 : i32
    %c0_i32_0 = arith.constant 0 : i32
    return %arg0, %c0_i32 : i32, i32
  }
}

</mosaic_0001>

<bundles_post_ra>
// kernel: tpu_custom_call.1
= control target key start
LH: loop header
LB: loop body
LE: loop exit
PB: predicated region body
PF: predicated region fallthrough
CT: control target
= control target key end

     0   :  { %s351_s0 = inlined_call_operand.vmem [shape: f32[16,32], index: 0, kind: input, shape index: {}]   ;;  %s352_s1 = inlined_call_operand.vmem [shape: bf16[32,128], index: 1, kind: input, shape index: {}]   ;;  %s353_s2 = inlined_call_operand.vmem [shape: f32[1,128], index: 2, kind: input, shape index: {}]   ;;  %s354_s3 = inlined_call_operand.vmem [shape: bf16[128,32], index: 3, kind: input, shape index: {}]   ;;  %s355_s4 = inlined_call_operand.vmem [shape: f32[1,32], index: 4, kind: input, shape index: {}]   ;;  %s356_s5 = inlined_call_operand.hbm [shape: f32[16,32], index: 5, kind: output, shape index: {}]  }
   0x1   :  { %v226_v0 = vld [vmem:[%s352_s1 + $0x8] sm:$0xff]  ;;  %v225_v1 = vld [vmem:[%s352_s1] sm:$0xff] }
   0x2   :  { %v22_v2 = vld [vmem:[%s351_s0] sm:$0xff]  ;;  %55 = vmatpush.bf16.msra.mxu0 %v226_v0  ;;  %v23_v3 = vld [vmem:[%s351_s0 + $0x8] sm:$0xff] }
   0x3   :  { %10 = vsyncpa [#allocation3], 0  ;;  %v24_v4 = vpack.c.bf16 %v23_v3, %v22_v2  ;;  %vm45_vm0 = vcmask 261120   ;;  %v234_v5 = vld [vmem:[%s354_s3 + $0x38] sm:$0xff]  ;;  %v233_v6 = vld [vmem:[%s354_s3 + $0x30] sm:$0xff]  ;;  %s270_s17 = smov [#allocation2]  }
   0x4   :  { %150 = vmatpush.bf16.msra.mxu1 %v234_v5  ;;  %v232_v7 = vld [vmem:[%s354_s3 + $0x28] sm:$0xff]  ;;  %v231_v8 = vld [vmem:[%s354_s3 + $0x20] sm:$0xff]  ;;  %v230_v9 = vld [vmem:[%s354_s3 + $0x18] sm:$0xff]  ;;  %s170_s18 = sshll.u32 %s270_s17, 4  ;;  %s172_s21 = sshll.u32 %s356_s5, 4  ;;  %s171_s18 = int_to_ptr.vmem [resolvable:$true] %s170_s18  ;;  %s173_s21 = int_to_ptr.hbm [resolvable:$true] %s172_s21 }
   0x5   :  { %v229_v10 = vld [vmem:[%s354_s3 + $0x10] sm:$0xff]  ;;  %v228_v11 = vld [vmem:[%s354_s3 + $0x8] sm:$0xff]  ;;  %v238_v12 = vld [vmem:[%s353_s2] ss:$0 sm:$0xff]  ;;  %s271_s22 = smov 128   ;;  %s272_s23 = smov 8  }
   0x6   :  { %56 = vmatpush.bf16.msra.mxu0 %v225_v1  ;;  %v227_v13 = vld [vmem:[%s354_s3] sm:$0xff] }
   0x7   :  { %v239_v37 = vld [vmem:[%s355_s4] ss:$0 sm:$0xff] }
   0x8   :  { %151 = vmatpush.bf16.msra.mxu1 %v233_v6 }
   0x9   :  { %192 = vmatmul.msk.bf16.vlgmr.msra.gmra.mxu0 %vm45_vm0, %v24_v4 }
   0xc   :  { %152 = vmatpush.bf16.msra.mxu1 %v232_v7 }
  0x10   :  { %153 = vmatpush.bf16.msra.mxu1 %v231_v8 }
  0x14   :  { %154 = vmatpush.bf16.msra.mxu1 %v230_v9 }
  0x18   :  { %155 = vmatpush.bf16.msra.mxu1 %v229_v10 }
  0x1c   :  { %156 = vmatpush.bf16.msra.mxu1 %v228_v11 }
  0x20   :  { %157 = vmatpush.bf16.msra.mxu1 %v227_v13 }
  0x86   :  { %v58_v14 = vpop.f32.mrf.mxu0 }
  0x87   :  { %v59_v15 = vadd.f32 %v238_v12, %v58_v14 }
  0x89   :  { %v63_v16 = vmul.f32 %v59_v15, %v59_v15 }
  0x8b   :  { %v65_v17 = vmul.f32 %v63_v16, %v59_v15 }
  0x8d   :  { %v67_v18 = vmul.f32 0.044715, %v65_v17 }
  0x8e   :  { %v60_v19 = vpop.f32.mrf.mxu0 }
  0x8f   :  { %v69_v20 = vadd.f32 %v67_v18, %v59_v15  ;;  %v61_v21 = vadd.f32 %v238_v12, %v60_v19 }
  0x91   :  { %v64_v22 = vmul.f32 %v61_v21, %v61_v21  ;;  %v71_v23 = vmul.f32 0.7978846, %v69_v20 }
  0x93   :  { %v66_v24 = vmul.f32 %v64_v22, %v61_v21  ;;  %240 = vtanh.f32 %v71_v23 }
  0x95   :  { %v68_v25 = vmul.f32 0.044715, %v66_v24 }
  0x97   :  { %v70_v26 = vadd.f32 %v68_v25, %v61_v21 }
  0x99   :  { %v72_v27 = vmul.f32 0.7978846, %v70_v26  ;;  %v241_v28 = vpop.eup %240 }
  0x9a   :  { %v75_v29 = vadd.f32 1.0, %v241_v28 }
  0x9b   :  { %242 = vtanh.f32 %v72_v27 }
  0x9c   :  { %v77_v32 = vmul.f32 0.5, %v75_v29 }
  0x9e   :  { %v79_v34 = vmul.f32 %v77_v32, %v59_v15 }
  0xa1   :  { %v243_v30 = vpop.eup %242 }
  0xa2   :  { %v76_v31 = vadd.f32 1.0, %v243_v30 }
  0xa4   :  { %v78_v33 = vmul.f32 0.5, %v76_v31 }
  0xa6   :  { %v80_v35 = vmul.f32 %v78_v33, %v61_v21 }
  0xa8   :  { %v81_v36 = vpack.c.bf16 %v80_v35, %v79_v34 }
  0xaa   :  { %158 = vmatmul.bf16.vlgmr.msra.gmra.mxu1 %v81_v36 }
 0x127   :  { %v159_v38 = vpop.f32.mrf.mxu1 }
 0x128   :  { %v160_v39 = vadd.f32 %v239_v37, %v159_v38 }
 0x12a   :  { %164 = vst.msk [vmem:[#allocation2] sm:$0xff] %vm45_vm0, %v160_v39 }
 0x12f   :  { %v161_v40 = vpop.f32.mrf.mxu1 }
 0x130   :  { %v162_v41 = vadd.f32 %v239_v37, %v161_v40 }
 0x132   :  { %165 = vst.msk [vmem:[#allocation2 + $0x8] sm:$0xff] %vm45_vm0, %v162_v41 }
 0x133   :  { %178 = dma.vmem_to_hbm [thread:$0]  %s171_s18, 256, %s173_s21, [#allocation3], %s271_s22, %s271_s22, %s272_s23  }
 0x134   :  { %268 = dma.done.wait [#allocation3], 256  }
 0x135   :  { %269 = vsyncadd [#allocation3], 4294967040 }
 0x136   :  { %183 = vsyncpa [#allocation3], 1 }

</bundles_post_ra>
